<compile_context>
chip_gen: v7x
topology: tpu7x:2x2x1
jax: 0.10.0
libtpu: 0.0.40
codegen_flags: <defaults>
</compile_context>

<pallas_src>
import functools

import jax
import jax.numpy as jnp
from jax.experimental import pallas as pl
from jax.experimental.pallas import tpu as pltpu


def _dma_copy_kernel(x_hbm, o_hbm, sems, *, chunks):
    """Pure HBM→HBM DMA copy: no VMEM staging, no vreg traffic.

    `chunks` is a static tuple of (row_offset, row_count) slabs along the
    leading axis; all DMAs are started before any wait so they overlap.
    """
    if len(chunks) == 1:
        cp = pltpu.make_async_copy(x_hbm, o_hbm, sems.at[0])
        cp.start()
        cp.wait()
        return

    copies = []
    for i, (off, sz) in enumerate(chunks):
        cp = pltpu.make_async_copy(
            x_hbm.at[pl.ds(off, sz)], o_hbm.at[pl.ds(off, sz)], sems.at[i]
        )
        cp.start()
        copies.append(cp)
    for cp in copies:
        cp.wait()


def np_model_forward(x, *, min_kernel_bytes=1 << 20, max_chunks=4):
    """Identity forward pass of NPModel as a Pallas TPU kernel.

    Note: if the caller donates `x` (jax.jit donate_argnums), the fastest
    correct implementation is literally `return x` with no kernel at all.
    """
    if x.size == 0:
        return x  # nothing to copy

    n_bytes = int(x.size) * x.dtype.itemsize

    # Small-input bypass: kernel launch + DMA setup dwarfs the copy time.
    if n_bytes <= min_kernel_bytes:
        return x

    # Chunk large arrays into a few outstanding DMAs along the leading axis.
    n_chunks = 1
    if x.ndim >= 1 and x.shape[0] >= 2 and n_bytes >= (4 << 20):
        n_chunks = min(max_chunks, x.shape[0])

    rows = x.shape[0] if x.ndim >= 1 else 1
    base, rem = divmod(rows, n_chunks)
    chunks, off = [], 0
    for i in range(n_chunks):
        sz = base + (1 if i < rem else 0)
        chunks.append((off, sz))
        off += sz

    return pl.pallas_call(
        functools.partial(_dma_copy_kernel, chunks=tuple(chunks)),
        out_shape=jax.ShapeDtypeStruct(x.shape, x.dtype),
        in_specs=[pl.BlockSpec(memory_space=pl.ANY)],
        out_specs=pl.BlockSpec(memory_space=pl.ANY),
        scratch_shapes=[pltpu.SemaphoreType.DMA((len(chunks),))],
        cost_estimate=pl.CostEstimate(
            flops=0, transcendentals=0, bytes_accessed=2 * n_bytes
        ),
    )(x)


if __name__ == "__main__":
    key = jax.random.PRNGKey(0)
    k0, k1 = jax.random.split(key)

    # NPModel has no parameters; forward(x) = x.  Small NCHW-like input.
    x = jax.random.normal(k0, (2, 4, 16, 16), dtype=jnp.float32)
    # Force the kernel path (bypass would otherwise make identity free here).
    y = np_model_forward(x, min_kernel_bytes=0)
    jax.block_until_ready(y)
    assert y.shape == x.shape and y.dtype == x.dtype
    assert bool(jnp.array_equal(y, x))

    # Larger input: exercises the multi-DMA (chunked) HBM→HBM path.
    x2 = jax.random.normal(k1, (512, 2048), dtype=jnp.float32)  # 4 MiB
    y2 = np_model_forward(x2)
    jax.block_until_ready(y2)
    assert y2.shape == x2.shape and y2.dtype == x2.dtype
    assert bool(jnp.array_equal(y2, x2))

    # Small-input bypass path (no kernel) is also the identity.
    y3 = np_model_forward(x)
    assert bool(jnp.array_equal(y3, x))

    print("KERNEL_OK")
</pallas_src>

<mosaic_0001>
module attributes {stable_mosaic.version = 11 : i64} {
  func.func @_dma_copy_kernel(%arg0: memref<2x4x16x16xf32, #tpu.memory_space<any>>, %arg1: memref<2x4x16x16xf32, #tpu.memory_space<any>>, %arg2: memref<1x!tpu.dma_semaphore, #tpu.memory_space<semaphore_mem>>) attributes {dimension_semantics = [], scalar_prefetch = 0 : i64, scratch_operands = 1 : i64, tpu.core_type = #tpu.core_type<tc>} {
    %c0_i32 = arith.constant 0 : i32
    %0 = tpu.memref_slice %arg2[%c0_i32] : memref<1x!tpu.dma_semaphore, #tpu.memory_space<semaphore_mem>> -> memref<1x!tpu.dma_semaphore, #tpu.memory_space<semaphore_mem>>
    %1 = tpu.memref_squeeze %0 : memref<1x!tpu.dma_semaphore, #tpu.memory_space<semaphore_mem>> -> memref<!tpu.dma_semaphore, #tpu.memory_space<semaphore_mem>>
    tpu.enqueue_dma source(%arg0 : memref<2x4x16x16xf32, #tpu.memory_space<any>>) target(%arg1 : memref<2x4x16x16xf32, #tpu.memory_space<any>>) target_semaphore(%1 : memref<!tpu.dma_semaphore, #tpu.memory_space<semaphore_mem>>)
    %c0_i32_0 = arith.constant 0 : i32
    %2 = tpu.memref_slice %arg2[%c0_i32_0] : memref<1x!tpu.dma_semaphore, #tpu.memory_space<semaphore_mem>> -> memref<1x!tpu.dma_semaphore, #tpu.memory_space<semaphore_mem>>
    %3 = tpu.memref_squeeze %2 : memref<1x!tpu.dma_semaphore, #tpu.memory_space<semaphore_mem>> -> memref<!tpu.dma_semaphore, #tpu.memory_space<semaphore_mem>>
    tpu.wait_dma2 semaphore(%3 : memref<!tpu.dma_semaphore, #tpu.memory_space<semaphore_mem>>) src(%arg0 : memref<2x4x16x16xf32, #tpu.memory_space<any>>) dst(%arg1 : memref<2x4x16x16xf32, #tpu.memory_space<any>>)
    return
  }
}

</mosaic_0001>

<bundles_post_ra>
// kernel: tpu_custom_call.1
= control target key start
LH: loop header
LB: loop body
LE: loop exit
PB: predicated region body
PF: predicated region fallthrough
CT: control target
= control target key end

     0   :  { %s36_s6 = smov [#allocation2]   ;;  %s37_s7 = smov [#allocation3]   ;;  %s55_s0 = inlined_call_operand.hbm [shape: f32[2,4,16,16], index: 0, kind: input, shape index: {}]   ;;  %s56_s1 = inlined_call_operand.hbm [shape: f32[2,4,16,16], index: 1, kind: output, shape index: {}]  }
   0x1   :  { %s38_s8 = smov 0  }
   0x2   :  { %18 = dma.general %s55_s0, 2048, %s56_s1, %s36_s6, %s37_s7, [#allocation4], %s38_s8, 0  }
   0x3   :  { %34 = dma.done.wait [#allocation2], 2048 }
   0x4   :  { %35 = vsyncadd [#allocation2], 4294965248 }
   0x5   :  { %24 = vsyncmov [#allocation2] }
   0x8   :  { %s25_s13 = vpop.sfrf %24 }
   0x9   :  { %p30_p0 = scmp.ne.s32.totalorder %s25_s13, 0 }
   0xb   :  { %29 = shalt.err (%p30_p0)  }

</bundles_post_ra>
